<compile_context>
chip_gen: v5e
topology: v5e:2x2
jax: 0.10.0
libtpu: 0.0.40
codegen_flags: <defaults>
</compile_context>

<pallas_src>
import functools

import jax
import jax.numpy as jnp
import numpy as np
from jax.experimental import pallas as pl
from jax.experimental.pallas import tpu as pltpu


def _round_up(n, m):
    return ((n + m - 1) // m) * m


def fold_gconv_params(weight, bias, *, in_hidden, num_adj_mats, order,
                      lane_pad=128):
    """One-time parameter prep (hoisted out of the per-call path).

    Folds the unused-index repetition of the torch forward into the weight:
        W_eff[:, k-block] = sum_i W[:, i-th copy of k-block]
    and lays it out as a single ((order+1)*C, out_pad) GEMM operand so the
    kernel projects the whole chain [x, Ax, ..., A^order x] with ONE matmul
    (K = (order+1)*C).  The output dim is zero-padded to a lane-dense multiple
    of 128 and the weight is cast to bf16 (f32 accumulation happens on the
    MXU inside the kernel).  Bias is padded and kept in f32.
    """
    out_hidden, d_in = weight.shape
    C = in_hidden
    assert d_in == C * (num_adj_mats * order + 1)

    w = jnp.asarray(weight, jnp.float32).reshape(
        out_hidden, 1 + num_adj_mats * order, C)
    w0 = w[:, :1, :]                                            # (O, 1, C)
    wk = w[:, 1:, :].reshape(out_hidden, num_adj_mats, order, C).sum(axis=1)
    w_eff = jnp.concatenate([w0, wk], axis=1)                   # (O, order+1, C)

    out_pad = _round_up(out_hidden, lane_pad)
    # (order+1, C, O) -> ((order+1)*C, O), padded along O, bf16.
    w_fold = jnp.transpose(w_eff, (1, 2, 0)).reshape((order + 1) * C, out_hidden)
    w_t = jnp.zeros(((order + 1) * C, out_pad), jnp.float32)
    w_t = w_t.at[:, :out_hidden].set(w_fold).astype(jnp.bfloat16)

    b_pad = jnp.zeros((1, out_pad), jnp.float32)
    b_pad = b_pad.at[0, :out_hidden].set(jnp.asarray(bias, jnp.float32))
    return w_t, b_pad, out_pad


def prep_gconv_adj(adj_mats):
    """Optional one-time prep: store the (typically static) adjacency in bf16
    so the dominant N^3 HBM stream is 2 bytes/elem.  The kernel also accepts
    f32 adjacency directly (it casts on-chip), so no bf16 copy of adj is ever
    materialized in HBM per forward call.
    On v7x one could store e4m3 here instead (MXU-native fp8) — gate on an
    accuracy check since error compounds through the A^order chain."""
    return jnp.asarray(adj_mats, jnp.bfloat16)


def _gconv_kernel(a_ref, x_ref, w_ref, b_ref, o_ref, *, order):
    # Cast the streamed operands on-chip (no per-call XLA convert pass in HBM).
    a = a_ref[...].astype(jnp.bfloat16)              # (TB, N, N)
    x = x_ref[...].astype(jnp.bfloat16)              # (TB, N, C)
    tb, n, c = x.shape

    # De-duplicated chain [x, A x, ..., A^order x]; the num_adj_mats
    # repetition of the torch forward is already folded into the weight.
    terms = [x]
    xk = x
    for _ in range(order):
        xk = jnp.einsum('bij,bjc->bic', a, xk,
                        preferred_element_type=jnp.float32).astype(jnp.bfloat16)
        terms.append(xk)
    hcat = jnp.concatenate(terms, axis=-1)           # (TB, N, (order+1)*C) bf16

    # One tall 2-D GEMM: M = TB*N, K = (order+1)*C, N = out_pad.
    # RHS goes through MXU weight registers once (not per batch), f32 acc.
    h2 = hcat.reshape(tb * n, (order + 1) * c)
    out = jnp.dot(h2, w_ref[...], preferred_element_type=jnp.float32)
    out = out + b_ref[...]                           # (TB*N, OP) + (1, OP)
    o_ref[...] = out.reshape(tb, n, -1).astype(o_ref.dtype)


def gconv_pallas(x, adj_mats, w_t, b_pad, *, out_hidden, order,
                 batch_tile=None, out_dtype=None,
                 vmem_budget_bytes=32 * 1024 * 1024,
                 vmem_limit_bytes=48 * 1024 * 1024,
                 min_grid_steps=4):
    B, N, C = x.shape
    Na, Nb, A = adj_mats.shape
    assert Na == N and Nb == N and A == N and B == N, (
        "literal torch.matmul broadcast semantics require num_adjs == N == B")
    K = (order + 1) * C
    assert w_t.shape[0] == K
    out_pad = w_t.shape[-1]
    if out_dtype is None:
        out_dtype = x.dtype            # pass jnp.bfloat16 to halve store bytes

    # ---- batch_tile selection -------------------------------------------
    # Largest divisor of B such that (a) the double-buffered per-step working
    # set (incl. resident weight/bias buffers and in-kernel temporaries) fits
    # the VMEM budget, and (b) the grid keeps >= min_grid_steps steps so
    # pipelining overlaps DMA with compute and v7x's 2nd TensorCore has work.
    if batch_tile is None:
        adj_bytes = jnp.dtype(adj_mats.dtype).itemsize
        x_bytes = jnp.dtype(x.dtype).itemsize
        o_bytes = jnp.dtype(out_dtype).itemsize
        per_b = (2 * N * N * adj_bytes          # adj tiles (double-buffered)
                 + 2 * N * C * x_bytes          # x tiles
                 + 2 * N * out_pad * o_bytes    # out tiles
                 + N * N * 2 + N * K * 2        # bf16 adj cast + chain concat
                 + N * out_pad * 4)             # f32 GEMM result
        resident = 2 * (K * out_pad * 2 + out_pad * 4)   # weight + bias bufs
        avail = max(vmem_budget_bytes - resident, per_b)
        tb_vmem = max(1, avail // per_b)
        tb_grid = max(1, B // min_grid_steps)
        batch_tile = max(1, min(B, tb_vmem, tb_grid))
        while B % batch_tile:
            batch_tile -= 1
    assert B % batch_tile == 0
    tb = batch_tile

    kernel = functools.partial(_gconv_kernel, order=order)

    out_full = pl.pallas_call(
        kernel,
        out_shape=jax.ShapeDtypeStruct((B, N, out_pad), out_dtype),
        grid_spec=pltpu.PrefetchScalarGridSpec(
            num_scalar_prefetch=0,
            grid=(B // tb,),
            in_specs=[
                # adj tiles: dominant HBM stream.  (On v5e/v6e this could use
                # pipeline_mode=pl.Buffered(3); keep default depth-2 to stay
                # within v7x's 64 MiB VMEM without retuning.)
                pl.BlockSpec((tb, N, N), lambda b: (b, 0, 0)),
                pl.BlockSpec((tb, N, C), lambda b: (b, 0, 0)),
                # Folded weight + bias: constant index_map, resident across
                # the grid (could be single-buffered; they are tiny).
                pl.BlockSpec((K, out_pad), lambda b: (0, 0)),
                pl.BlockSpec((1, out_pad), lambda b: (0, 0)),
            ],
            out_specs=pl.BlockSpec((tb, N, out_pad), lambda b: (b, 0, 0)),
        ),
        compiler_params=pltpu.CompilerParams(
            dimension_semantics=("parallel",),
            vmem_limit_bytes=vmem_limit_bytes),
    )(adj_mats, x, w_t, b_pad)

    # Slice off the lane padding (output traffic is O(N^2*OP), tiny vs. the
    # O(N^3) adj stream; consumers may also take the padded layout directly).
    return out_full[..., :out_hidden]


def gconv_ref(x, adj_mats, weight, bias, *, num_adj_mats, order):
    # Pure-JAX transcription of the PyTorch forward (same matmul broadcast
    # rules), full f32 precision.
    out = [x]
    for _ in range(num_adj_mats):
        _x = x
        for _ in range(order):
            _x = jnp.matmul(adj_mats, _x, precision=jax.lax.Precision.HIGHEST)
            out.append(_x)
    h = jnp.concatenate(out, axis=-1)
    return jnp.matmul(h, weight.T, precision=jax.lax.Precision.HIGHEST) + bias


if __name__ == "__main__":
    # Small shapes consistent with the module's literal semantics:
    # B == N == num_adj_mats (required by torch.matmul broadcasting here).
    B = N = NUM_ADJ = 8
    IN_HIDDEN = 16
    OUT_HIDDEN = 32
    ORDER = 2
    D_IN = IN_HIDDEN * (NUM_ADJ * ORDER + 1)

    key = jax.random.PRNGKey(0)
    kx, ka, kw, kb = jax.random.split(key, 4)

    x = jax.random.normal(kx, (B, N, IN_HIDDEN), dtype=jnp.float32)
    adj_mats = jax.random.uniform(ka, (N, N, NUM_ADJ), dtype=jnp.float32)

    # nn.Linear(D_IN, OUT_HIDDEN) init (uniform +-1/sqrt(fan_in)), deterministic.
    bound = 1.0 / np.sqrt(D_IN)
    weight = jax.random.uniform(kw, (OUT_HIDDEN, D_IN), jnp.float32,
                                minval=-bound, maxval=bound)
    bias = jax.random.uniform(kb, (OUT_HIDDEN,), jnp.float32,
                              minval=-bound, maxval=bound)

    # One-time prep (hoisted out of the per-call path): fold/pad the weight
    # and store the static adjacency in bf16.
    w_t, b_pad, _ = fold_gconv_params(weight, bias, in_hidden=IN_HIDDEN,
                                      num_adj_mats=NUM_ADJ, order=ORDER)
    adj_bf16 = prep_gconv_adj(adj_mats)

    fwd = jax.jit(functools.partial(gconv_pallas,
                                    out_hidden=OUT_HIDDEN, order=ORDER))
    out = jax.block_until_ready(fwd(x, adj_bf16, w_t, b_pad))

    ref = gconv_ref(x, adj_mats, weight, bias,
                    num_adj_mats=NUM_ADJ, order=ORDER)

    out_np = np.asarray(out)
    ref_np = np.asarray(ref)
    # bf16 streamed operands with f32 MXU accumulation vs. an f32 HIGHEST
    # reference: norm-scaled bf16-appropriate tolerance.
    scale = float(np.max(np.abs(ref_np)))
    np.testing.assert_allclose(out_np, ref_np, rtol=2e-2,
                               atol=2e-2 * scale + 1e-3)

    print("KERNEL_OK")
</pallas_src>

<mosaic_0001>
module attributes {stable_mosaic.version = 11 : i64} {
  func.func @_gconv_kernel(%arg0: i32, %arg1: memref<2x8x8xbf16, #tpu.memory_space<vmem>>, %arg2: memref<2x8x16xf32, #tpu.memory_space<vmem>>, %arg3: memref<48x128xbf16, #tpu.memory_space<vmem>>, %arg4: memref<1x128xf32, #tpu.memory_space<vmem>>, %arg5: memref<2x8x128xf32, #tpu.memory_space<vmem>>) attributes {dimension_semantics = [#tpu.dimension_semantics<parallel>], iteration_bounds = array<i64: 4>, scalar_prefetch = 0 : i64, scratch_operands = 0 : i64, tpu.core_type = #tpu.core_type<tc>, window_params = [{transform_indices = @transform_0, window_bounds = array<i64: 2, 8, 8>}, {transform_indices = @transform_1, window_bounds = array<i64: 2, 8, 16>}, {pipeline_mode = #tpu.pipeline_mode<synchronous>, transform_indices = @transform_2, window_bounds = array<i64: 48, 128>}, {pipeline_mode = #tpu.pipeline_mode<synchronous>, transform_indices = @transform_3, window_bounds = array<i64: 1, 128>}, {transform_indices = @transform_4, window_bounds = array<i64: 2, 8, 128>}]} {
    %c0 = arith.constant 0 : index
    %c0_0 = arith.constant 0 : index
    %c0_1 = arith.constant 0 : index
    %0 = vector.load %arg1[%c0, %c0_0, %c0_1] : memref<2x8x8xbf16, #tpu.memory_space<vmem>>, vector<2x8x8xbf16>
    %c0_2 = arith.constant 0 : index
    %c0_3 = arith.constant 0 : index
    %c0_4 = arith.constant 0 : index
    %1 = vector.load %arg2[%c0_2, %c0_3, %c0_4] : memref<2x8x16xf32, #tpu.memory_space<vmem>>, vector<2x8x16xf32>
    %2 = arith.truncf %1 : vector<2x8x16xf32> to vector<2x8x16xbf16>
    "tpu.trace_start"() <{level = 10 : i32, message = "bij,bjc->bic"}> : () -> ()
    %cst = arith.constant dense<0.000000e+00> : vector<2x8x16xf32>
    %3 = tpu.matmul %0, %2, %cst {dimension_numbers = #tpu.dot_dimension_numbers<[2], [1], [1], [2], [0, 0, 0, 1, 1, 2], [0], [0]>} : vector<2x8x8xbf16>, vector<2x8x16xbf16>, vector<2x8x16xf32> -> vector<2x8x16xf32>
    "tpu.trace_stop"() : () -> ()
    %4 = arith.truncf %3 : vector<2x8x16xf32> to vector<2x8x16xbf16>
    "tpu.trace_start"() <{level = 10 : i32, message = "bij,bjc->bic"}> : () -> ()
    %cst_5 = arith.constant dense<0.000000e+00> : vector<2x8x16xf32>
    %5 = tpu.matmul %0, %4, %cst_5 {dimension_numbers = #tpu.dot_dimension_numbers<[2], [1], [1], [2], [0, 0, 0, 1, 1, 2], [0], [0]>} : vector<2x8x8xbf16>, vector<2x8x16xbf16>, vector<2x8x16xf32> -> vector<2x8x16xf32>
    "tpu.trace_stop"() : () -> ()
    %6 = arith.truncf %5 : vector<2x8x16xf32> to vector<2x8x16xbf16>
    %7 = tpu.concatenate %2, %4, %6 in 2 : vector<2x8x16xbf16>, vector<2x8x16xbf16>, vector<2x8x16xbf16> -> vector<2x8x48xbf16>
    %8 = vector.shape_cast %7 : vector<2x8x48xbf16> to vector<16x48xbf16>
    %c0_6 = arith.constant 0 : index
    %c0_7 = arith.constant 0 : index
    %9 = vector.load %arg3[%c0_6, %c0_7] : memref<48x128xbf16, #tpu.memory_space<vmem>>, vector<48x128xbf16>
    %cst_8 = arith.constant dense<0.000000e+00> : vector<16x128xf32>
    %10 = tpu.matmul %8, %9, %cst_8 {dimension_numbers = #tpu.dot_dimension_numbers<[1], [0], [0], [1], [0, 0, 1, 1], [], []>} : vector<16x48xbf16>, vector<48x128xbf16>, vector<16x128xf32> -> vector<16x128xf32>
    %c0_9 = arith.constant 0 : index
    %c0_10 = arith.constant 0 : index
    %11 = vector.load %arg4[%c0_9, %c0_10] : memref<1x128xf32, #tpu.memory_space<vmem>>, vector<1x128xf32>
    %12 = vector.broadcast %11 : vector<1x128xf32> to vector<16x128xf32>
    %13 = arith.addf %10, %12 : vector<16x128xf32>
    %14 = vector.shape_cast %13 : vector<16x128xf32> to vector<2x8x128xf32>
    %c0_11 = arith.constant 0 : index
    %c0_12 = arith.constant 0 : index
    %c0_13 = arith.constant 0 : index
    %15 = vector.load %arg5[%c0_11, %c0_12, %c0_13] : memref<2x8x128xf32, #tpu.memory_space<vmem>>, vector<2x8x128xf32>
    tpu.vector_store %arg5[%c0_11, %c0_12, %c0_13], %14 {strides = array<i32>} : memref<2x8x128xf32, #tpu.memory_space<vmem>>, vector<2x8x128xf32>,
    return
  }
  func.func @transform_0(%arg0: i32) -> (i32, i32, i32) {
    %c0_i32 = arith.constant 0 : i32
    %c0_i32_0 = arith.constant 0 : i32
    %c0_i32_1 = arith.constant 0 : i32
    return %arg0, %c0_i32, %c0_i32_0 : i32, i32, i32
  }
  func.func @transform_1(%arg0: i32) -> (i32, i32, i32) {
    %c0_i32 = arith.constant 0 : i32
    %c0_i32_0 = arith.constant 0 : i32
    %c0_i32_1 = arith.constant 0 : i32
    return %arg0, %c0_i32, %c0_i32_0 : i32, i32, i32
  }
  func.func @transform_2(%arg0: i32) -> (i32, i32) {
    %c0_i32 = arith.constant 0 : i32
    %c0_i32_0 = arith.constant 0 : i32
    %c0_i32_1 = arith.constant 0 : i32
    return %c0_i32, %c0_i32_0 : i32, i32
  }
  func.func @transform_3(%arg0: i32) -> (i32, i32) {
    %c0_i32 = arith.constant 0 : i32
    %c0_i32_0 = arith.constant 0 : i32
    %c0_i32_1 = arith.constant 0 : i32
    return %c0_i32, %c0_i32_0 : i32, i32
  }
  func.func @transform_4(%arg0: i32) -> (i32, i32, i32) {
    %c0_i32 = arith.constant 0 : i32
    %c0_i32_0 = arith.constant 0 : i32
    %c0_i32_1 = arith.constant 0 : i32
    return %arg0, %c0_i32, %c0_i32_0 : i32, i32, i32
  }
}

</mosaic_0001>

<bundles_post_ra>
// kernel: gconv_pallas.1
= control target key start
LH: loop header
LB: loop body
LE: loop exit
PB: predicated region body
PF: predicated region fallthrough
CT: control target
= control target key end

     0   :  { %s1069_s0 = inlined_call_operand.hbm [shape: bf16[8,8,8], index: 0, kind: input, shape index: {}]   ;;  %s1070_s1 = inlined_call_operand.hbm [shape: f32[8,8,16], index: 1, kind: input, shape index: {}]   ;;  %s1071_s2 = inlined_call_operand.hbm [shape: bf16[48,128], index: 2, kind: input, shape index: {}]   ;;  %s1072_s3 = inlined_call_operand.vmem [shape: f32[1,128], index: 3, kind: input, shape index: {}]   ;;  %s1073_s4 = inlined_call_operand.hbm [shape: f32[8,8,128], index: 4, kind: output, shape index: {}]  }
   0x1   :  { %1077 = sst [smem:[#allocation15_spill]] %s1071_s2 }
   0x2   :  { %9 = vsyncpa [#allocation3], 0 }
   0x3   :  { %11 = vsyncpa [#allocation3 + $0x1], 0 }
   0x4   :  { %12 = vsyncpa [#allocation6], 0 }
   0x5   :  { %14 = vsyncpa [#allocation6 + $0x1], 0 }
   0x6   :  { %15 = vsyncpa [#allocation4], 0 }
   0x7   :  { %17 = vsyncpa [#allocation4 + $0x1], 0  ;;  %s880_s15 = smov 0   ;;  %s882_s16 = smov 0  }
   0x8   :  { %s884_s17 = smov 0   ;;  %s886_s18 = smov 0  }
   0x9 LB: > { %1078 = sst [smem:[#allocation13_spill]] %s840_s17  ;;  %s901_s19 = sadd.s32 4294967295, %s844_s18   ;;  %s844_s18 = sphi %s886_s18, %s1092_s18   ;;  %s840_s17 = sphi %s884_s17, %s1089_s17   ;;  %s836_s16 = sphi %s882_s16, %s1091_s16   ;;  %s832_s15 = sphi %s880_s15, %s1090_s15  }
   0xa   : > { %s566_s20 = sadd.s32 4294967294, %s844_s18   ;;  %p43_p0 = scmp.ne.s32.totalorder %s836_s16, %s832_s15 }
   0xb   : > { %p44_p1 = scmp.eq.s32.totalorder %s901_s19, 0  ;;  %p135_p2 = scmp.eq.s32.totalorder %s901_s19, 3 }
   0xc   : > { %p141_p3 = scmp.eq.s32.totalorder %s566_s20, 3  ;;  %p567_p5 = scmp.ge.s32.totalorder %s844_s18, 1 }
   0xd   : > { %p910_p4 = por %p44_p1, %p43_p0  ;;  %p148_p7 = scmp.lt.s32.totalorder %s844_s18, 5 }
   0xe   : > { %p915_p6 = por %p141_p3, %p43_p0  ;;  %s1081_s2 = sld [smem:[#allocation15_spill]] }
   0xf   : > { %p923_p8 = pnand %p567_p5, %p148_p7  ;;  %s846_s27 = smov [#allocation7]  }
  0x10   : > { %s161_s28 = sshll.u32 %s846_s27, 4  ;;  %s932_s29 = sadd.s32 1, %s844_s18   ;;  %s162_s28 = int_to_ptr.vmem [resolvable:$true] %s161_s28 }
  0x11   : > { %p619_p9 = pneg %p923_p8  ;;  %s1074_s30 = smov 64  }
  0x12   : > { %s1075_s5 = smov 4   ;;  %s27_s6 = ssub.s32 %s844_s18, %s932_s29 }
  0x13   : > { %p620_p10 = pnand %p619_p9, %p44_p1  ;;  %s30_s7 = sadd.s32 1, %s840_s17 }
  0x14   : > { %s159_s25 = sshll.u32 %s1081_s2, 4  ;;  %p28_p11 = scmp.eq.s32.totalorder %s27_s6, 0  ;;  %s160_s25 = int_to_ptr.hbm [resolvable:$true] %s159_s25 }
  0x15   : > { %622 = dma.hbm_to_vmem [thread:$0]  (!%p620_p10), %s160_s25, 384, %s162_s28, [#allocation6], %s1074_s30, %s1074_s30, %s1075_s5  }
  0x16   : > { %p37_p12 = scmp.ne.s32.totalorder %s840_s17, %s836_s16  ;;  %p38_p13 = scmp.eq.s32.totalorder %s844_s18, 0 }
  0x17   : > { %p635_p0 = scmp.lt.s32.totalorder %s844_s18, 4  ;;  %s954_s10 = sand.u32 1, %s840_s17  }
  0x18   : > { %s945_s8 = scalar_select %p28_p11, %s840_s17, %s30_s7  }
  0x19   : > { %p39_p3 = por %p38_p13, %p37_p12  ;;  %p949_p5 = por %p135_p2, %p37_p12 }
  0x1a   : > { %1083 = sst [smem:[#allocation14_spill]] %s945_s8  ;;  %s603_s11 = sshll.u32 %s844_s18, 3 }
  0x1b   : > { %s570_s12 = sshll.u32 %s954_s10, 3  ;;  %s187_s20 = scalar_lea.hbm %s1069_s0, %s603_s11 }
  0x1c   : > { %s188_s23 = sshll.u32 %s187_s20, 4  ;;  %s182_s24 = scalar_lea.vmem [#allocation2], %s570_s12  ;;  %s189_s23 = int_to_ptr.hbm [resolvable:$true] %s188_s23 }
  0x1d   : > { %s190_s25 = sshll.u32 %s182_s24, 4  ;;  %p963_p2 = pnand %p635_p0, %p39_p3  ;;  %s191_s25 = int_to_ptr.vmem [resolvable:$true] %s190_s25 }
  0x1e   : > { %s200_s28 = sand.u32 1, %s844_s18   ;;  %s573_s6 = sshll.u32 %s954_s10, 4 }
  0x1f   : > { %s179_s7 = scalar_lea.sflag [#allocation3], %s954_s10  ;;  %s710_s30 = sshra.s32 %s189_s23, 4  ;;  %s711_s30 = int_to_ptr.hbm [resolvable:$true] %s710_s30 }
  0x20   : > { %s712_s5 = scalar_lea.hbm %s711_s30, 8  ;;  %p714_p9 = pneg %p963_p2 }
  0x21   : > { %p713_p7 = scmp.ne.s32.totalorder %s711_s30, %s712_s5  ;;  %s717_s13 = scalar_lea.hbm %s1069_s0, 32 }
  0x22   : > { %p718_p12 = scmp.lt.s32.totalorder %s711_s30, %s1069_s0  ;;  %p719_p13 = scmp.lt.s32.totalorder %s717_s13, %s712_s5 }
  0x23   : > { %p715_p10 = pnand %p714_p9, %p713_p7 }
  0x24   : > { %p720_p0 = por %p719_p13, %p718_p12 }
  0x25   : > { %p716_p11 = pneg %p715_p10 }
  0x27   : > { %p721_p3 = pnand %p720_p0, %p716_p11 }
  0x29   : > { %724 = shalt.err (!%p721_p3)
}
  0x2a   : > { %s1086_s10 = smov 4   ;;  %s1087_s24 = smov 64  }
  0x2b   : > { %626 = dma.hbm_to_vmem [thread:$0]  (!%p963_p2), %s189_s23, 128, %s191_s25, %s179_s7, %s1087_s24, %s1087_s24, %s1086_s10  }
  0x2c   : > { %s604_s2 = sshll.u32 %s844_s18, 4  ;;  %s204_s8 = scalar_lea.vmem [#allocation5], %s573_s6 }
  0x2d   : > { %s212_s11 = sshll.u32 %s204_s8, 4  ;;  %s209_s14 = scalar_lea.hbm %s1070_s1, %s604_s2  ;;  %s213_s11 = int_to_ptr.vmem [resolvable:$true] %s212_s11 }
  0x2e   : > { %s210_s30 = sshll.u32 %s209_s14, 4  ;;  %s201_s5 = scalar_lea.sflag [#allocation6], %s200_s28  ;;  %s211_s30 = int_to_ptr.hbm [resolvable:$true] %s210_s30 }
  0x2f   : > { %s740_s13 = sshra.s32 %s211_s30, 4  ;;  %s747_s8 = scalar_lea.hbm %s1070_s1, 64  ;;  %s741_s13 = int_to_ptr.hbm [resolvable:$true] %s740_s13 }
  0x30   : > { %s742_s20 = scalar_lea.hbm %s741_s13, 16  ;;  %p748_p12 = scmp.lt.s32.totalorder %s741_s13, %s1070_s1 }
  0x31   : > { %p743_p7 = scmp.ne.s32.totalorder %s741_s13, %s742_s20  ;;  %p749_p13 = scmp.lt.s32.totalorder %s747_s8, %s742_s20 }
  0x33   : > { %p745_p10 = pnand %p743_p7, %p714_p9  ;;  %p750_p0 = por %p749_p13, %p748_p12 }
  0x35   : > { %p746_p11 = pneg %p745_p10 }
  0x37   : > { %p751_p3 = pnand %p750_p0, %p746_p11 }
  0x39   : > { %754 = shalt.err (!%p751_p3)
}
  0x3a   : > { %s849_s2 = smov 128   ;;  %s850_s17 = smov 8  }
  0x3b   : > { %629 = dma.hbm_to_vmem [thread:$0]  (!%p963_p2), %s211_s30, 256, %s213_s11, %s201_s5, %s849_s2, %s849_s2, %s850_s17  }
  0x3c   : > { %224 = sbr.rel (%p923_p8) target bundleno = 617 (0x269), region = 36  ;;  %s1004_s28 = sand.u32 (!%p923_p8), 1, %s836_s16  }
  0x3d   : > { %s577_s10 = sshll.u32 (!%p923_p8), %s1004_s28, 3  ;;  %s227_s24 = scalar_lea.sflag (!%p923_p8), [#allocation3], %s1004_s28 }
  0x3e   : > { %s230_s12 = scalar_lea.vmem (!%p923_p8), [#allocation2], %s577_s10 }
  0x41   : > { %815 = dma.done.wait (%p910_p4), %s227_s24, 128  }
  0x42   : > { %817 = vsyncadd (%p910_p4), %s227_s24, 4294967168  ;;  %s236_s26 = sand.u32 1, %s901_s19   ;;  %s578_s27 = sshll.u32 %s1004_s28, 4 }
  0x43   : > { %s237_s11 = scalar_lea.sflag [#allocation6], %s236_s26  ;;  %s240_s14 = scalar_lea.vmem [#allocation5], %s578_s27 }
  0x44   : > { %819 = dma.done.wait (%p910_p4), %s237_s11, 256  }
  0x45   : > { %821 = vsyncadd (%p910_p4), %s237_s11, 4294967040 }
  0x46   : > { %823 = dma.done.wait (%p44_p1), [#allocation6], 384  }
  0x47   : > { %825 = vsyncadd (%p44_p1), [#allocation6], 4294966912  ;;  %v282_v0 = vld [vmem:[%s240_s14] sm:$0xff]  ;;  %vm290_vm0 = vcmask 1043456   ;;  %v283_v1 = vld [vmem:[%s240_s14 + $0x8] sm:$0xff]  ;;  %vm286_vm1 = vcmask 64512  }
  0x48   : > { %v284_v2 = vpack.c.bf16 %v282_v0, %v282_v0  ;;  %v285_v3 = vpack.c.bf16 %v283_v1, %v283_v1  ;;  %v280_v6 = vld [vmem:[%s230_s12] sm:$0xf]  ;;  %v281_v7 = vld [vmem:[%s230_s12 + $0x4] sm:$0xf]  ;;  %s851_s21 = smov 16   ;;  %s852_s30 = smov 32  }
  0x49   : > { %v607_v20 = vld [vmem:[#allocation7 + $0x10] sm:$0xff]  ;;  %v606_v31 = vld [vmem:[#allocation7 + $0x8] sm:$0xff]  ;;  %v605_v32 = vld [vmem:[#allocation7] sm:$0xff]  ;;  %vm382_vm2 = vcmask 130048   ;;  %vm387_vm3 = vcmask 261120   ;;  %vm425_vm4 = vcmask 392192  }
  0x4a   : > { %v292_v4 = vsel %vm290_vm0, %v284_v2, 0  ;;  %v311_v5 = vsel %vm290_vm0, %v285_v3, 0  ;;  %v679_v44 = vld [vmem:[%s1072_s3] ss:$0 sm:$0xff]  ;;  %s608_s20 = sshll.u32 %s901_s19, 4  ;;  %s275_s6 = scalar_lea.vmem [#allocation8], %s578_s27 }
  0x4b   : > { %301 = vmatpush.bf16.msra.mxu0 %v292_v4  ;;  %320 = vmatpush.bf16.msra.mxu1 %v311_v5  ;;  %s457_s8 = scalar_lea.hbm %s1073_s4, %s608_s20  ;;  %s458_s7 = sshll.u32 %s275_s6, 4  ;;  %s459_s7 = int_to_ptr.vmem [resolvable:$true] %s458_s7 }
  0x4c   : > { %s460_s2 = sshll.u32 %s457_s8, 4  ;;  %s446_s17 = scalar_lea.sflag [#allocation4], %s1004_s28  ;;  %s461_s2 = int_to_ptr.hbm [resolvable:$true] %s460_s2 }
  0x4d   : > { %s784_s10 = sshra.s32 %s461_s2, 4  ;;  %s790_s26 = scalar_lea.hbm %s1073_s4, 64  ;;  %s785_s10 = int_to_ptr.hbm [resolvable:$true] %s784_s10 }
  0x4e   : > { %581 = vmatmul.msk.bf16.vlgmr.msra.gmra.mxu0 %vm286_vm1, %v280_v6  ;;  %582 = vmatmul.msk.bf16.vlgmr.msra.gmra.mxu1 %vm286_vm1, %v281_v7  ;;  %s786_s19 = scalar_lea.hbm %s785_s10, 16  ;;  %p791_p2 = scmp.lt.s32.totalorder %s785_s10, %s1073_s4 }
  0x4f   : > { %434 = vmatpush.bf16.msrb.mxu0 %v607_v20  ;;  %p787_p1 = scmp.ne.s32.totalorder %s785_s10, %s786_s19  ;;  %p792_p9 = scmp.lt.s32.totalorder %s790_s26, %s786_s19 }
  0x51   : > { %p788_p4 = pnand %p787_p1, %p949_p5  ;;  %p793_p7 = por %p792_p9, %p791_p2 }
  0x53   : > { %435 = vmatpush.bf16.msrb.mxu0 %v606_v31  ;;  %p789_p8 = pneg %p788_p4 }
  0x55   : > { %p794_p10 = pnand %p793_p7, %p789_p8 }
  0x57   : > { %436 = vmatpush.bf16.msrb.mxu0 %v605_v32 }
  0xcb   : > { %v303_v8 = vpop.f32.mrf.mxu0  ;;  %v322_v9 = vpop.f32.mrf.mxu1 }
  0xcc   : > { %v326_v10 = vpack.c.bf16 %v303_v8, %v303_v8  ;;  %v327_v11 = vpack.c.bf16 %v322_v9, %v322_v9 }
  0xce   : > { %v329_v12 = vsel %vm290_vm0, %v326_v10, 0  ;;  %v345_v13 = vsel %vm290_vm0, %v327_v11, 0  ;;  %v364_v14 = vunpack.c.l.b16 %v326_v10  ;;  %v365_v16 = vunpack.c.l.b16 %v327_v11 }
  0xcf   : > { %338 = vmatpush.bf16.msra.mxu2 %v329_v12  ;;  %354 = vmatpush.bf16.msra.mxu3 %v345_v13 }
  0xd0   : > { %v366_v15 = vpack.c.b16 %v364_v14, %v364_v14  ;;  %v367_v19 = vpack.c.b16 %v365_v16, %v365_v16 }
  0xd2   : > { %584 = vmatmul.msk.bf16.vlgmr.msra.gmra.mxu3 %vm286_vm1, %v281_v7  ;;  %368 = vrot.lane.b32.xlu0 %v366_v15, %s851_s21 }
  0xd3   : > { %583 = vmatmul.msk.bf16.vlgmr.msra.gmra.mxu2 %vm286_vm1, %v280_v6  ;;  %v305_v17 = vpop.f32.mrf.mxu0  ;;  %v324_v18 = vpop.f32.mrf.mxu1 }
  0xda   : > { %370 = vrot.lane.b32.xlu0 %v367_v19, %s851_s21 }
 0x144   : > { %v369_v33 = vpop.permute.xlu0 %368 }
 0x145   : > { %v384_v36 = vsel %vm382_vm2, %v284_v2, %v369_v33 }
 0x14c   : > { %v371_v35 = vpop.permute.xlu0 %370 }
 0x14d   : > { %v386_v38 = vsel %vm382_vm2, %v285_v3, %v371_v35 }
 0x155   : > { %v356_v21 = vpop.f32.mrf.mxu3 }
 0x156   : > { %v340_v22 = vpop.f32.mrf.mxu2  ;;  %v361_v25 = vpack.c.bf16 %v356_v21, %v356_v21 }
 0x157   : > { %v360_v23 = vpack.c.bf16 %v340_v22, %v340_v22 }
 0x158   : > { %v375_v27 = vunpack.c.l.b16 %v361_v25 }
 0x159   : > { %v374_v24 = vunpack.c.l.b16 %v360_v23 }
 0x15a   : > { %v377_v30 = vpack.c.b16 %v375_v27, %v375_v27 }
 0x15b   : > { %v376_v26 = vpack.c.b16 %v374_v24, %v374_v24 }
 0x15d   : > { %378 = vrot.lane.b32.xlu1 %v376_v26, %s852_s30  ;;  %v358_v28 = vpop.f32.mrf.mxu3 }
 0x15e   : > { %v342_v29 = vpop.f32.mrf.mxu2 }
 0x165   : > { %380 = vrot.lane.b32.xlu1 %v377_v30, %s852_s30 }
 0x1cf   : > { %v379_v34 = vpop.permute.xlu1 %378 }
 0x1d0   : > { %v389_v37 = vsel %vm387_vm3, %v384_v36, %v379_v34 }
 0x1d1   : > { %v404_v41 = vunpack.c.l.b16 %v389_v37 }
 0x1d7   : > { %v381_v39 = vpop.permute.xlu1 %380 }
 0x1d8   : > { %v391_v40 = vsel %vm387_vm3, %v386_v38, %v381_v39 }
 0x1d9   : > { %v405_v42 = vunpack.c.l.b16 %v391_v40 }
 0x1db   : > { %v406_v43 = vpack.c.b16 %v405_v42, %v404_v41 }
 0x1dd   : > { %597 = vmatmul.msk.bf16.vlgmr.msrb.gmra.mxu0 %vm425_vm4, %v406_v43 }
 0x25a   : > { %v438_v45 = vpop.f32.mrf.mxu0 }
 0x25b   : > { %v439_v46 = vadd.f32 %v679_v44, %v438_v45 }
 0x25d   : > { %443 = vst [vmem:[%s275_s6] sm:$0xff] %v439_v46 }
 0x262   : > { %v440_v47 = vpop.f32.mrf.mxu0 }
 0x263   : > { %v441_v48 = vadd.f32 %v679_v44, %v440_v47 }
 0x265   : > { %444 = vst [vmem:[%s275_s6 + $0x8] sm:$0xff] %v441_v48 }
 0x266   : > { %797 = shalt.err (!%p794_p10)
}
 0x267   : > { %s853_s28 = smov 128   ;;  %s854_s14 = smov 8  }
 0x268   : > { %617 = dma.vmem_to_hbm [thread:$0]  (%p949_p5), %s459_s7, 256, %s461_s2, %s446_s17, %s853_s28, %s853_s28, %s854_s14  }
 0x269 PF: > { %p637_p11 = scmp.ge.s32.totalorder %s844_s18, 2  ;;  %s475_s21 = sand.u32 1, %s832_s15  }
 0x26a   : > { %s476_s30 = scalar_lea.sflag [#allocation4], %s475_s21 }
 0x26b   : > { %p631_p12 = pnand %p637_p11, %p915_p6 }
 0x26d   : > { %p632_p13 = pneg %p631_p12 }
 0x26f   : > { %827 = dma.done.wait (%p632_p13), %s476_s30, 256  }
 0x270   : > { %829 = vsyncadd (%p632_p13), %s476_s30, 4294967040  ;;  %s1088_s5 = sld [smem:[#allocation13_spill]]  ;;  %p20_p0 = scmp.ge.s32.totalorder %s932_s29, 6  }
 0x271   : > { %s1089_s17 = sld [smem:[#allocation14_spill]]  ;;  %s1090_s15 = smov %s836_s16 }
 0x272   : > { %s1092_s18 = smov %s932_s29  ;;  %22 = sbr.rel (!%p20_p0) target bundleno = 9 (0x9), region = 98 }
 0x276   : > { %s1091_s16 = smov %s1088_s5 }
 0x277   :  { %482 = vsyncpa [#allocation3], 1 }
 0x278   :  { %484 = vsyncpa [#allocation3 + $0x1], 1 }
 0x279   :  { %485 = vsyncpa [#allocation6], 1 }
 0x27a   :  { %487 = vsyncpa [#allocation6 + $0x1], 1 }
 0x27b   :  { %488 = vsyncpa [#allocation4], 1 }
 0x27c   :  { %490 = vsyncpa [#allocation4 + $0x1], 1 }

</bundles_post_ra>
